<compile_context>
chip_gen: v5e
topology: v5e:2x2
jax: 0.10.0
libtpu: 0.0.40
codegen_flags: <defaults>
</compile_context>

<pallas_src>
import jax
import jax.numpy as jnp
from jax import lax
from jax.experimental import pallas as pl

# ----------------------------- problem sizes ------------------------------
B = 2       # graphs per batch
N = 8       # max nodes per graph
BN = B * N  # nodes folded into the sublane axis
F = 16      # node feature dim
H = 32      # encoder hidden dim
L = 16      # latent dim
HD = 32     # decoder hidden dim


def _softplus(x):
    # numerically stable softplus
    return jnp.maximum(x, 0.0) + jnp.log1p(jnp.exp(-jnp.abs(x)))


# ------------------------------ Pallas kernel ------------------------------
def vae_kernel(
    x_ref, adj_ref, at_ref, wmask_ref, pool_ref, expand_ref, eps_ref,
    wenc_ref, b1_ref, whead_ref, bhead_ref, wd1_ref, bd1_ref,
    pnode_ref, wbil_ref, bout_ref,
    out_ref,
):
    x = x_ref[...]           # (BN, F)   dense node features, batch folded into sublanes
    adj = adj_ref[...]       # (BN, BN)  block-diagonal message-passing adjacency
    at = at_ref[...]         # (BN, BN)  block-diagonal ground-truth adjacency
    wmask = wmask_ref[...]   # (BN, BN)  node_mask * 1/(B * n_valid_g^2) (precomputed)
    pool = pool_ref[...]     # (B, BN)   masked mean-pool matrix (precomputed)
    expand = expand_ref[...] # (BN, B)   graph -> node broadcast matrix (precomputed)
    eps = eps_ref[...]       # (B, L)    reparameterization noise

    # ---------------- encoder q(z | x, edge_index, batch) ----------------
    msg = jnp.dot(adj, x, preferred_element_type=jnp.float32)                 # (BN, F)
    xcat = jnp.concatenate([x, msg], axis=1)                                  # (BN, 2F)
    h = jnp.dot(xcat, wenc_ref[...], preferred_element_type=jnp.float32)      # fused W0/W1
    h = jnp.maximum(h + b1_ref[...], 0.0)                                     # (BN, H)

    g = jnp.dot(pool, h, preferred_element_type=jnp.float32)                  # (B, H) mean pool

    head = jnp.dot(g, whead_ref[...], preferred_element_type=jnp.float32) + bhead_ref[...]  # (B, 2L)
    mu = head[:, :L]                                                          # (B, L)
    logvar = head[:, L:]                                                      # (B, L)
    std = jnp.exp(0.5 * logvar)

    # rsample (reparameterization)
    z = mu + std * eps                                                        # (B, L)

    # KL( N(mu, std) || N(0, 1) ), summed over latent dim, mean over batch
    kl_elem = 0.5 * (mu * mu + std * std - 1.0 - logvar)                      # (B, L)
    kl_mean = jnp.sum(kl_elem, keepdims=True) * (1.0 / B)                     # (1, 1)

    # ---------------- decoder p(A | z): Bernoulli logits ----------------
    hd = jnp.maximum(
        jnp.dot(z, wd1_ref[...], preferred_element_type=jnp.float32) + bd1_ref[...], 0.0)  # (B, HD)
    hd_bn = jnp.dot(expand, hd, preferred_element_type=jnp.float32)           # (BN, HD)
    hn = jnp.maximum(pnode_ref[...] + hd_bn, 0.0)                             # (BN, HD)
    tmp = jnp.dot(hn, wbil_ref[...], preferred_element_type=jnp.float32)      # (BN, HD)
    logits = lax.dot_general(
        tmp, hn, dimension_numbers=(((1,), (1,)), ((), ())),
        preferred_element_type=jnp.float32) + bout_ref[...]                   # (BN, BN)
    # cross-graph blocks of `logits` are junk but are zeroed by wmask below.

    # TODO(synk): scipy.optimize.linear_sum_assignment (Hungarian matching) has
    # no Pallas equivalent; identity permutation is used (== reconstruction_loss).

    # masked Bernoulli log-prob:  log p(A|logits) = A*l - softplus(l)
    lp = at * logits - _softplus(logits)                                      # (BN, BN)
    recon = jnp.sum(lp * wmask, keepdims=True)                                # (1, 1)  already per-graph-mean'd

    elbo = recon - kl_mean
    out_ref[...] = jnp.concatenate([-elbo, -recon, kl_mean, recon], axis=1)   # (1, 4) lane-dense


# ------------------------------ glue / wrapper ------------------------------
def init_params(key):
    ks = jax.random.split(key, 8)
    s = 0.1
    return dict(
        W0=s * jax.random.normal(ks[0], (F, H), jnp.float32),
        W1=s * jax.random.normal(ks[1], (F, H), jnp.float32),
        b1=jnp.zeros((1, H), jnp.float32),
        Wmu=s * jax.random.normal(ks[2], (H, L), jnp.float32),
        bmu=jnp.zeros((1, L), jnp.float32),
        Wlv=s * jax.random.normal(ks[3], (H, L), jnp.float32),
        blv=jnp.zeros((1, L), jnp.float32),
        Wd1=s * jax.random.normal(ks[4], (L, HD), jnp.float32),
        bd1=jnp.zeros((1, HD), jnp.float32),
        Pnode=s * jax.random.normal(ks[5], (N, HD), jnp.float32),
        Wbil=s * jax.random.normal(ks[6], (HD, HD), jnp.float32),
        bout=jnp.zeros((1, 1), jnp.float32),
    )


def vae_forward(x, edge_index, batch, Adj, num_nodes_per_graph, params, eps):
    """Returns (-elbo, -recon_loss, kl) like VAE.forward / negative_elbo."""
    nv = jnp.maximum(num_nodes_per_graph.astype(jnp.float32), 1.0)             # (B,)
    valid = (jnp.arange(N)[None, :] < num_nodes_per_graph[:, None]).astype(jnp.float32)  # (B, N)

    # PyG-style (x, edge_index, batch) -> block-diagonal dense layout (batch folded in sublanes)
    offsets = jnp.concatenate(
        [jnp.zeros((1,), jnp.int32), jnp.cumsum(num_nodes_per_graph)[:-1].astype(jnp.int32)])
    local = jnp.arange(x.shape[0], dtype=jnp.int32) - offsets[batch]
    pos = batch * N + local                                                     # node row in (BN, .) layout

    x_flat = jnp.zeros((BN, F), jnp.float32).at[pos].set(x)
    src, dst = edge_index[0], edge_index[1]
    adj_bd = jnp.zeros((BN, BN), jnp.float32).at[pos[src], pos[dst]].set(1.0)

    # block-diagonal true adjacency + precomputed weighted log-prob mask
    mask_blocks = valid[:, :, None] * valid[:, None, :]                         # (B, N, N)
    w_blocks = mask_blocks / (B * nv * nv)[:, None, None]                       # 1/(B * n_valid^2) weights
    a_true_bd = jnp.zeros((BN, BN), jnp.float32)
    wmask_bd = jnp.zeros((BN, BN), jnp.float32)
    for g in range(B):  # B is a static Python constant
        sl = slice(g * N, (g + 1) * N)
        a_true_bd = a_true_bd.at[sl, sl].set(Adj[g])
        wmask_bd = wmask_bd.at[sl, sl].set(w_blocks[g])

    # pooling (graph mean over valid nodes) and graph->node broadcast matrices
    graph_of_pos = jnp.repeat(jnp.arange(B), N)                                 # (BN,)
    onehot = (graph_of_pos[None, :] == jnp.arange(B)[:, None]).astype(jnp.float32)  # (B, BN)
    pool_mat = onehot * (valid.reshape(-1) / nv[graph_of_pos])[None, :]         # (B, BN)
    expand_mat = onehot.T                                                       # (BN, B)

    # fused parameters (host-side, jit-traced glue)
    W_enc = jnp.concatenate([params["W0"], params["W1"]], axis=0)               # (2F, H)
    W_head = jnp.concatenate([params["Wmu"], params["Wlv"]], axis=1)            # (H, 2L)
    b_head = jnp.concatenate([params["bmu"], params["blv"]], axis=1)            # (1, 2L)
    Pnode_t = jnp.tile(params["Pnode"], (B, 1))                                 # (BN, HD)

    out = pl.pallas_call(
        vae_kernel,
        out_shape=jax.ShapeDtypeStruct((1, 4), jnp.float32),
    )(x_flat, adj_bd, a_true_bd, wmask_bd, pool_mat, expand_mat, eps,
      W_enc, params["b1"], W_head, b_head, params["Wd1"], params["bd1"],
      Pnode_t, params["Wbil"], params["bout"])

    neg_elbo = out[0, 0]
    neg_recon = out[0, 1]
    kl = out[0, 2]
    return neg_elbo, neg_recon, kl


# ---------------------------------- main ----------------------------------
if __name__ == "__main__":
    key = jax.random.PRNGKey(0)
    k_params, k_x, k_eps = jax.random.split(key, 3)

    params = init_params(k_params)

    # two ring graphs: 6 nodes and 8 nodes
    nums = [6, 8]
    num_nodes_per_graph = jnp.array(nums, dtype=jnp.int32)
    total_nodes = sum(nums)

    x = jax.random.normal(k_x, (total_nodes, F), jnp.float32)
    batch = jnp.array(sum(([g] * n for g, n in enumerate(nums)), []), dtype=jnp.int32)

    edges = []
    offset = 0
    adj_list = [[0.0] * (N * N) for _ in range(B)]
    for g, n in enumerate(nums):
        for a in range(n):
            b = (a + 1) % n
            edges.append((offset + a, offset + b))
            edges.append((offset + b, offset + a))
            adj_list[g][a * N + b] = 1.0
            adj_list[g][b * N + a] = 1.0
        offset += n
    edge_index = jnp.array(edges, dtype=jnp.int32).T            # (2, E)
    Adj = jnp.array(adj_list, dtype=jnp.float32).reshape(B, N, N)

    eps = jax.random.normal(k_eps, (B, L), jnp.float32)

    fwd = jax.jit(vae_forward)
    neg_elbo, neg_recon, kl = fwd(x, edge_index, batch, Adj, num_nodes_per_graph, params, eps)
    jax.block_until_ready((neg_elbo, neg_recon, kl))
    print("KERNEL_OK")
</pallas_src>

<mosaic_0001>
module attributes {stable_mosaic.version = 11 : i64} {
  func.func @vae_kernel(%arg0: memref<16x16xf32, #tpu.memory_space<vmem>>, %arg1: memref<16x16xf32, #tpu.memory_space<vmem>>, %arg2: memref<16x16xf32, #tpu.memory_space<vmem>>, %arg3: memref<16x16xf32, #tpu.memory_space<vmem>>, %arg4: memref<2x16xf32, #tpu.memory_space<vmem>>, %arg5: memref<16x2xf32, #tpu.memory_space<vmem>>, %arg6: memref<2x16xf32, #tpu.memory_space<vmem>>, %arg7: memref<32x32xf32, #tpu.memory_space<vmem>>, %arg8: memref<1x32xf32, #tpu.memory_space<vmem>>, %arg9: memref<32x32xf32, #tpu.memory_space<vmem>>, %arg10: memref<1x32xf32, #tpu.memory_space<vmem>>, %arg11: memref<16x32xf32, #tpu.memory_space<vmem>>, %arg12: memref<1x32xf32, #tpu.memory_space<vmem>>, %arg13: memref<16x32xf32, #tpu.memory_space<vmem>>, %arg14: memref<32x32xf32, #tpu.memory_space<vmem>>, %arg15: memref<1x1xf32, #tpu.memory_space<vmem>>, %arg16: memref<1x4xf32, #tpu.memory_space<vmem>>) attributes {dimension_semantics = [], scalar_prefetch = 0 : i64, scratch_operands = 0 : i64, tpu.core_type = #tpu.core_type<tc>} {
    %c0 = arith.constant 0 : index
    %c0_0 = arith.constant 0 : index
    %0 = vector.load %arg0[%c0, %c0_0] : memref<16x16xf32, #tpu.memory_space<vmem>>, vector<16x16xf32>
    %c0_1 = arith.constant 0 : index
    %c0_2 = arith.constant 0 : index
    %1 = vector.load %arg1[%c0_1, %c0_2] : memref<16x16xf32, #tpu.memory_space<vmem>>, vector<16x16xf32>
    %c0_3 = arith.constant 0 : index
    %c0_4 = arith.constant 0 : index
    %2 = vector.load %arg2[%c0_3, %c0_4] : memref<16x16xf32, #tpu.memory_space<vmem>>, vector<16x16xf32>
    %c0_5 = arith.constant 0 : index
    %c0_6 = arith.constant 0 : index
    %3 = vector.load %arg3[%c0_5, %c0_6] : memref<16x16xf32, #tpu.memory_space<vmem>>, vector<16x16xf32>
    %c0_7 = arith.constant 0 : index
    %c0_8 = arith.constant 0 : index
    %4 = vector.load %arg4[%c0_7, %c0_8] : memref<2x16xf32, #tpu.memory_space<vmem>>, vector<2x16xf32>
    %c0_9 = arith.constant 0 : index
    %c0_10 = arith.constant 0 : index
    %5 = vector.load %arg5[%c0_9, %c0_10] : memref<16x2xf32, #tpu.memory_space<vmem>>, vector<16x2xf32>
    %c0_11 = arith.constant 0 : index
    %c0_12 = arith.constant 0 : index
    %6 = vector.load %arg6[%c0_11, %c0_12] : memref<2x16xf32, #tpu.memory_space<vmem>>, vector<2x16xf32>
    %cst = arith.constant dense<0.000000e+00> : vector<16x16xf32>
    %7 = tpu.matmul %1, %0, %cst {dimension_numbers = #tpu.dot_dimension_numbers<[1], [0], [0], [1], [0, 0, 1, 1], [], []>} : vector<16x16xf32>, vector<16x16xf32>, vector<16x16xf32> -> vector<16x16xf32>
    %8 = tpu.concatenate %0, %7 in 1 : vector<16x16xf32>, vector<16x16xf32> -> vector<16x32xf32>
    %c0_13 = arith.constant 0 : index
    %c0_14 = arith.constant 0 : index
    %9 = vector.load %arg7[%c0_13, %c0_14] : memref<32x32xf32, #tpu.memory_space<vmem>>, vector<32x32xf32>
    %cst_15 = arith.constant dense<0.000000e+00> : vector<16x32xf32>
    %10 = tpu.matmul %8, %9, %cst_15 {dimension_numbers = #tpu.dot_dimension_numbers<[1], [0], [0], [1], [0, 0, 1, 1], [], []>} : vector<16x32xf32>, vector<32x32xf32>, vector<16x32xf32> -> vector<16x32xf32>
    %c0_16 = arith.constant 0 : index
    %c0_17 = arith.constant 0 : index
    %11 = vector.load %arg8[%c0_16, %c0_17] : memref<1x32xf32, #tpu.memory_space<vmem>>, vector<1x32xf32>
    %12 = vector.broadcast %11 : vector<1x32xf32> to vector<16x32xf32>
    %13 = arith.addf %10, %12 : vector<16x32xf32>
    %cst_18 = arith.constant 0.000000e+00 : f32
    %14 = vector.broadcast %cst_18 : f32 to vector<16x32xf32>
    %15 = arith.maximumf %13, %14 : vector<16x32xf32>
    %cst_19 = arith.constant dense<0.000000e+00> : vector<2x32xf32>
    %16 = tpu.matmul %4, %15, %cst_19 {dimension_numbers = #tpu.dot_dimension_numbers<[1], [0], [0], [1], [0, 0, 1, 1], [], []>} : vector<2x16xf32>, vector<16x32xf32>, vector<2x32xf32> -> vector<2x32xf32>
    %c0_20 = arith.constant 0 : index
    %c0_21 = arith.constant 0 : index
    %17 = vector.load %arg9[%c0_20, %c0_21] : memref<32x32xf32, #tpu.memory_space<vmem>>, vector<32x32xf32>
    %cst_22 = arith.constant dense<0.000000e+00> : vector<2x32xf32>
    %18 = tpu.matmul %16, %17, %cst_22 {dimension_numbers = #tpu.dot_dimension_numbers<[1], [0], [0], [1], [0, 0, 1, 1], [], []>} : vector<2x32xf32>, vector<32x32xf32>, vector<2x32xf32> -> vector<2x32xf32>
    %c0_23 = arith.constant 0 : index
    %c0_24 = arith.constant 0 : index
    %19 = vector.load %arg10[%c0_23, %c0_24] : memref<1x32xf32, #tpu.memory_space<vmem>>, vector<1x32xf32>
    %20 = vector.broadcast %19 : vector<1x32xf32> to vector<2x32xf32>
    %21 = arith.addf %18, %20 : vector<2x32xf32>
    %22 = vector.extract_strided_slice %21 {offsets = [0, 0], sizes = [2, 16], strides = [1, 1]} : vector<2x32xf32> to vector<2x16xf32>
    %23 = vector.extract_strided_slice %21 {offsets = [0, 16], sizes = [2, 16], strides = [1, 1]} : vector<2x32xf32> to vector<2x16xf32>
    %cst_25 = arith.constant 5.000000e-01 : f32
    %24 = vector.broadcast %cst_25 : f32 to vector<2x16xf32>
    %25 = arith.mulf %24, %23 : vector<2x16xf32>
    %26 = math.exp %25 : vector<2x16xf32>
    %27 = arith.mulf %26, %6 : vector<2x16xf32>
    %28 = arith.addf %22, %27 : vector<2x16xf32>
    %29 = arith.mulf %22, %22 : vector<2x16xf32>
    %30 = arith.mulf %26, %26 : vector<2x16xf32>
    %31 = arith.addf %29, %30 : vector<2x16xf32>
    %cst_26 = arith.constant 1.000000e+00 : f32
    %32 = vector.broadcast %cst_26 : f32 to vector<2x16xf32>
    %33 = arith.subf %31, %32 : vector<2x16xf32>
    %34 = arith.subf %33, %23 : vector<2x16xf32>
    %cst_27 = arith.constant 5.000000e-01 : f32
    %35 = vector.broadcast %cst_27 : f32 to vector<2x16xf32>
    %36 = arith.mulf %35, %34 : vector<2x16xf32>
    %37 = vector.shape_cast %36 : vector<2x16xf32> to vector<1x2x16xf32>
    %cst_28 = arith.constant dense<0.000000e+00> : vector<1xf32>
    %38 = vector.multi_reduction <add>, %37, %cst_28 [1, 2] : vector<1x2x16xf32> to vector<1xf32>
    %39 = vector.shape_cast %38 : vector<1xf32> to vector<1x1x1xf32>
    %40 = vector.extract %39[0, 0, 0] : f32 from vector<1x1x1xf32>
    %41 = vector.broadcast %40 : f32 to vector<1x1xf32>
    %cst_29 = arith.constant 5.000000e-01 : f32
    %42 = vector.broadcast %cst_29 : f32 to vector<1x1xf32>
    %43 = arith.mulf %41, %42 : vector<1x1xf32>
    %c0_30 = arith.constant 0 : index
    %c0_31 = arith.constant 0 : index
    %44 = vector.load %arg11[%c0_30, %c0_31] : memref<16x32xf32, #tpu.memory_space<vmem>>, vector<16x32xf32>
    %cst_32 = arith.constant dense<0.000000e+00> : vector<2x32xf32>
    %45 = tpu.matmul %28, %44, %cst_32 {dimension_numbers = #tpu.dot_dimension_numbers<[1], [0], [0], [1], [0, 0, 1, 1], [], []>} : vector<2x16xf32>, vector<16x32xf32>, vector<2x32xf32> -> vector<2x32xf32>
    %c0_33 = arith.constant 0 : index
    %c0_34 = arith.constant 0 : index
    %46 = vector.load %arg12[%c0_33, %c0_34] : memref<1x32xf32, #tpu.memory_space<vmem>>, vector<1x32xf32>
    %47 = vector.broadcast %46 : vector<1x32xf32> to vector<2x32xf32>
    %48 = arith.addf %45, %47 : vector<2x32xf32>
    %cst_35 = arith.constant 0.000000e+00 : f32
    %49 = vector.broadcast %cst_35 : f32 to vector<2x32xf32>
    %50 = arith.maximumf %48, %49 : vector<2x32xf32>
    %cst_36 = arith.constant dense<0.000000e+00> : vector<16x32xf32>
    %51 = tpu.matmul %5, %50, %cst_36 {dimension_numbers = #tpu.dot_dimension_numbers<[1], [0], [0], [1], [0, 0, 1, 1], [], []>} : vector<16x2xf32>, vector<2x32xf32>, vector<16x32xf32> -> vector<16x32xf32>
    %c0_37 = arith.constant 0 : index
    %c0_38 = arith.constant 0 : index
    %52 = vector.load %arg13[%c0_37, %c0_38] : memref<16x32xf32, #tpu.memory_space<vmem>>, vector<16x32xf32>
    %53 = arith.addf %52, %51 : vector<16x32xf32>
    %cst_39 = arith.constant 0.000000e+00 : f32
    %54 = vector.broadcast %cst_39 : f32 to vector<16x32xf32>
    %55 = arith.maximumf %53, %54 : vector<16x32xf32>
    %c0_40 = arith.constant 0 : index
    %c0_41 = arith.constant 0 : index
    %56 = vector.load %arg14[%c0_40, %c0_41] : memref<32x32xf32, #tpu.memory_space<vmem>>, vector<32x32xf32>
    %cst_42 = arith.constant dense<0.000000e+00> : vector<16x32xf32>
    %57 = tpu.matmul %55, %56, %cst_42 {dimension_numbers = #tpu.dot_dimension_numbers<[1], [0], [0], [1], [0, 0, 1, 1], [], []>} : vector<16x32xf32>, vector<32x32xf32>, vector<16x32xf32> -> vector<16x32xf32>
    %cst_43 = arith.constant dense<0.000000e+00> : vector<16x16xf32>
    %58 = tpu.matmul %57, %55, %cst_43 {dimension_numbers = #tpu.dot_dimension_numbers<[1], [1], [0], [0], [0, 0, 1, 0], [], []>} : vector<16x32xf32>, vector<16x32xf32>, vector<16x16xf32> -> vector<16x16xf32>
    %c0_44 = arith.constant 0 : index
    %c0_45 = arith.constant 0 : index
    %59 = vector.load %arg15[%c0_44, %c0_45] : memref<1x1xf32, #tpu.memory_space<vmem>>, vector<1x1xf32>
    %60 = vector.broadcast %59 : vector<1x1xf32> to vector<16x16xf32>
    %61 = arith.addf %58, %60 : vector<16x16xf32>
    %62 = arith.mulf %2, %61 : vector<16x16xf32>
    %cst_46 = arith.constant 0.000000e+00 : f32
    %63 = vector.broadcast %cst_46 : f32 to vector<16x16xf32>
    %64 = arith.maximumf %61, %63 : vector<16x16xf32>
    %65 = math.absf %61 : vector<16x16xf32>
    %cst_47 = arith.constant 0.000000e+00 : f32
    %66 = vector.broadcast %cst_47 : f32 to vector<16x16xf32>
    %67 = arith.subf %66, %65 : vector<16x16xf32>
    %68 = math.exp %67 : vector<16x16xf32>
    %69 = math.log1p %68 : vector<16x16xf32>
    %70 = arith.addf %64, %69 : vector<16x16xf32>
    %71 = arith.subf %62, %70 : vector<16x16xf32>
    %72 = arith.mulf %71, %3 : vector<16x16xf32>
    %73 = vector.shape_cast %72 : vector<16x16xf32> to vector<1x16x16xf32>
    %cst_48 = arith.constant dense<0.000000e+00> : vector<1xf32>
    %74 = vector.multi_reduction <add>, %73, %cst_48 [1, 2] : vector<1x16x16xf32> to vector<1xf32>
    %75 = vector.shape_cast %74 : vector<1xf32> to vector<1x1x1xf32>
    %76 = vector.extract %75[0, 0, 0] : f32 from vector<1x1x1xf32>
    %77 = vector.broadcast %76 : f32 to vector<1x1xf32>
    %78 = arith.subf %77, %43 : vector<1x1xf32>
    %cst_49 = arith.constant 0.000000e+00 : f32
    %79 = vector.broadcast %cst_49 : f32 to vector<1x1xf32>
    %80 = arith.subf %79, %78 : vector<1x1xf32>
    %cst_50 = arith.constant 0.000000e+00 : f32
    %81 = vector.broadcast %cst_50 : f32 to vector<1x1xf32>
    %82 = arith.subf %81, %77 : vector<1x1xf32>
    %83 = tpu.concatenate %80, %82, %43, %77 in 1 : vector<1x1xf32>, vector<1x1xf32>, vector<1x1xf32>, vector<1x1xf32> -> vector<1x4xf32>
    %c0_51 = arith.constant 0 : index
    %c0_52 = arith.constant 0 : index
    %84 = vector.load %arg16[%c0_51, %c0_52] : memref<1x4xf32, #tpu.memory_space<vmem>>, vector<1x4xf32>
    tpu.vector_store %arg16[%c0_51, %c0_52], %83 {strides = array<i32>} : memref<1x4xf32, #tpu.memory_space<vmem>>, vector<1x4xf32>,
    return
  }
}

</mosaic_0001>

<bundles_post_ra>
// kernel: eq.8
= control target key start
LH: loop header
LB: loop body
LE: loop exit
PB: predicated region body
PF: predicated region fallthrough
CT: control target
= control target key end

     0   :  { %vm7_vm0 = vcmask 64512   ;;  %vm13_vm1 = vcmask 130112   ;;  %s39_s0 = inlined_call_operand.vmem [shape: s32[2,8], index: 0, kind: input, shape index: {}]   ;;  %s40_s1 = inlined_call_operand.vmem [shape: s32[16], index: 1, kind: output, shape index: {}]  }
   0x1   :  { %v4_v0 = vld [vmem:[%s39_s0] sm:$0x3]  ;;  %s22_s0 = smov 8  }
   0x2   :  { %5 = vst [vmem:[#allocation1] sm:$0x3] %v4_v0 }
   0x9   :  { %v10_v1 = vld [vmem:[#allocation1 + $0x1] sm:$0x1]   ;;  %v6_v2 = vld [vmem:[#allocation1] sm:$0x1]  }
   0xa   :  { %11 = vrot.lane.b32.xlu0 %v10_v1, %s22_s0  ;;  %8 = vst.msk [vmem:[#allocation0] sm:$0x1] %vm7_vm0, %v6_v2  }
  0x7c   :  { %v12_v3 = vpop.permute.xlu0 %11  }
  0x7d   :  { %14 = vst.msk [vmem:[#allocation0] sm:$0x1] %vm13_vm1, %v12_v3  }
  0x84   :  { %v17_v4 = vld [vmem:[#allocation0] sm:$0x1] }
  0x85   :  { %20 = vst [vmem:[%s40_s1] sm:$0x1] %v17_v4 }

// kernel: vae_forward.1
= control target key start
LH: loop header
LB: loop body
LE: loop exit
PB: predicated region body
PF: predicated region fallthrough
CT: control target
= control target key end

     0   :  { %vm67_vm0 = vcmask 130048   ;;  %vm115_vm1 = vcmask 261120   ;;  %v486_v29 = vmov 0   ;;  %vm228_vm2 = vcmask 123904   ;;  %s699_s0 = inlined_call_operand.vmem [shape: f32[16,16], index: 0, kind: input, shape index: {}]   ;;  %s700_s1 = inlined_call_operand.vmem [shape: f32[16,16], index: 1, kind: input, shape index: {}]   ;;  %s701_s7 = inlined_call_operand.vmem [shape: f32[32,32], index: 7, kind: input, shape index: {}]   ;;  %s702_s8 = inlined_call_operand.vmem [shape: f32[1,32], index: 8, kind: input, shape index: {}]   ;;  %s703_s9 = inlined_call_operand.vmem [shape: f32[32,32], index: 9, kind: input, shape index: {}]   ;;  %s704_s4 = inlined_call_operand.vmem [shape: f32[2,16], index: 4, kind: input, shape index: {}]   ;;  %s705_s10 = inlined_call_operand.vmem [shape: f32[1,32], index: 10, kind: input, shape index: {}]   ;;  %s706_s6 = inlined_call_operand.vmem [shape: f32[2,16], index: 6, kind: input, shape index: {}]   ;;  %s707_s15 = inlined_call_operand.<no memory space> [shape: f32[1,1], index: 15, kind: input, shape index: {}]   ;;  %s708_s11 = inlined_call_operand.vmem [shape: f32[16,32], index: 11, kind: input, shape index: {}]   ;;  %s709_s12 = inlined_call_operand.vmem [shape: f32[1,32], index: 12, kind: input, shape index: {}]   ;;  %s710_s5 = inlined_call_operand.vmem [shape: f32[16,2], index: 5, kind: input, shape index: {}]   ;;  %s711_s14 = inlined_call_operand.vmem [shape: f32[32,32], index: 14, kind: input, shape index: {}]   ;;  %s712_s13 = inlined_call_operand.vmem [shape: f32[16,32], index: 13, kind: input, shape index: {}]   ;;  %s713_s2 = inlined_call_operand.vmem [shape: f32[16,16], index: 2, kind: input, shape index: {}]   ;;  %s714_s3 = inlined_call_operand.vmem [shape: f32[16,16], index: 3, kind: input, shape index: {}]   ;;  %s715_s16 = inlined_call_operand.vmem [shape: f32[1,4], index: 16, kind: output, shape index: {}]  }
   0x1   :  { %717 = sst [smem:[#allocation3_spill]] %s699_s0  ;;  %v57_v2 = vld [vmem:[%s700_s1] sm:$0xff]  ;;  %v58_v3 = vld [vmem:[%s700_s1 + $0x8] sm:$0xff]  ;;  %v110_v4 = vld [vmem:[%s701_s7 + $0x18] sm:$0xff]  ;;  %s485_s1 = smov 16   ;;  %v21_v28 = vstv %s707_s15  ;;  %469 = vset.pattern.permute.xlu2 %v486_v29  ;;  %470 = vset.pattern.permute.xlu0 %v486_v29  ;;  %vm278_vm3 = vcmask 1041408  }
   0x2   :  { %s718_s23 = sld [smem:[#allocation3_spill]]  ;;  %v109_v5 = vld [vmem:[%s701_s7 + $0x10] sm:$0xff]  ;;  %v108_v6 = vld [vmem:[%s701_s7 + $0x8] sm:$0xff]  ;;  %v107_v9 = vld [vmem:[%s701_s7] sm:$0xff]  ;;  %22 = vst [vmem:[#allocation2] sm:$0x1] %v21_v28 }
   0x3   :  { %v173_v14 = vld [vmem:[%s703_s9 + $0x18] sm:$0xff]  ;;  %v172_v15 = vld [vmem:[%s703_s9 + $0x10] sm:$0xff]  ;;  %v171_v16 = vld [vmem:[%s703_s9 + $0x8] sm:$0xff]  ;;  %vm271_vm4 = vcmask 15360   ;;  %vm432_vm7 = vcmask 7168   ;;  %vm435_vm8 = vcmask 23552  }
   0x4   :  { %193 = vmatpush.msra.mxu3 %v173_v14  ;;  %v471_v18 = vld [vmem:[%s702_s8] ss:$0 sm:$0xff]  ;;  %v242_v40 = vld [vmem:[%s708_s11 + $0x8] sm:$0xff]  ;;  %vm437_vm9 = vcmask 24576  }
   0x5   :  { %v63_v24 = vld [vmem:[%s704_s4] sm:$0x3] }
   0x6   :  { %194 = vmatpush.msra.mxu3 %v172_v15  ;;  %v170_v25 = vld [vmem:[%s703_s9] sm:$0xff] }
   0x7   :  { %v66_v26 = vld [vmem:[%s706_s6] sm:$0x3]  ;;  %s487_s6 = smov 112  }
   0x8   :  { %v56_v0 = vld [vmem:[%s718_s23 + $0x8] sm:$0xff]  ;;  %v55_v1 = vld [vmem:[%s718_s23] sm:$0xff]  ;;  %195 = vmatpush.msra.mxu3 %v171_v16  ;;  %205 = vrot.lane.b32.xlu1 %v66_v26, %s485_s1 }
   0x9   :  { %88 = vmatpush.msra.mxu0 %v56_v0  ;;  %460 = vmatpush.msra.mxu1 %v56_v0  ;;  %v473_v30 = vld [vmem:[#allocation2] ss:$0 sm:$0xff] }
   0xa   :  { %196 = vmatpush.msra.mxu3 %v170_v25  ;;  %348 = vperm.xlu2 %469, %v473_v30   ;;  %v472_v31 = vld [vmem:[%s705_s10] ss:$0 sm:$0xff] }
   0xb   :  { %89 = vmatpush.msra.mxu0 %v55_v1  ;;  %461 = vmatpush.msra.mxu1 %v55_v1  ;;  %v241_v42 = vld [vmem:[%s708_s11] sm:$0xff] }
   0xc   :  { %443 = vmatmul.msk.f32.vlgmr.msra.gmra.mxu0 %vm67_vm0, %v57_v2  ;;  %444 = vmatmul.msk.f32.vlgmr.msra.gmra.mxu1 %vm67_vm0, %v58_v3  ;;  %v474_v60 = vld [vmem:[%s709_s12] ss:$0 sm:$0xff]  ;;  %v65_v2 = vld [vmem:[%s710_s5 + $0x8] sm:$0xff]  ;;  %v313_v3 = vld [vmem:[%s711_s14 + $0x10] sm:$0xff] }
   0xd   :  { %134 = vmatpush.msrb.mxu1 %v110_v4  ;;  %v312_v4 = vld [vmem:[%s711_s14 + $0x8] sm:$0xff] }
   0xf   :  { %135 = vmatpush.msrb.mxu1 %v109_v5  ;;  %v311_v5 = vld [vmem:[%s711_s14] sm:$0xff] }
  0x11   :  { %136 = vmatpush.msrb.mxu1 %v108_v6  ;;  %v305_v6 = vld [vmem:[%s712_s13] sm:$0xff] }
  0x13   :  { %137 = vmatpush.msrb.mxu1 %v107_v9 }
  0x64   :  { %v638_v41 = vpop.permute.xlu2 %348 }
  0x7a   :  { %v206_v36 = vpop.permute.xlu1 %205 }
  0x89   :  { %v91_v7 = vpop.f32.mrf.mxu0  ;;  %v94_v8 = vpop.f32.mrf.mxu1 }
  0x8a   :  { %99 = vrot.lane.b32.xlu0 %v91_v7, %s485_s1 }
  0x92   :  { %101 = vrot.lane.b32.xlu0 %v94_v8, %s485_s1 }
  0xfc   :  { %v100_v10 = vpop.permute.xlu0 %99 }
  0xfd   :  { %v105_v11 = vsel %vm67_vm0, %v55_v1, %v100_v10  ;;  %v314_v1 = vld [vmem:[%s711_s14 + $0x18] sm:$0xff]  ;;  %v306_v10 = vld [vmem:[%s712_s13 + $0x8] sm:$0xff] }
  0xfe   :  { %445 = vmatmul.msk.f32.vlgmr.msrb.gmra.mxu1 %vm115_vm1, %v105_v11  ;;  %333 = vmatpush.msrb.mxu0 %v314_v1 }
 0x100   :  { %334 = vmatpush.msrb.mxu0 %v313_v3 }
 0x102   :  { %335 = vmatpush.msrb.mxu0 %v312_v4 }
 0x104   :  { %v102_v12 = vpop.permute.xlu0 %101  ;;  %336 = vmatpush.msrb.mxu0 %v311_v5 }
 0x105   :  { %v106_v13 = vsel %vm67_vm0, %v56_v0, %v102_v12  ;;  %v64_v0 = vld [vmem:[%s710_s5] sm:$0xff] }
 0x106   :  { %446 = vmatmul.msk.f32.gmra.mxu1 %vm115_vm1, %v106_v13 }
 0x17b   :  { %v139_v17 = vpop.f32.mrf.mxu1 }
 0x17c   :  { %v140_v20 = vadd.f32 %v471_v18, %v139_v17 }
 0x17e   :  { %v145_v23 = vmax.f32 %v140_v20, 0.0 }
 0x183   :  { %v142_v19 = vpop.f32.mrf.mxu1 }
 0x184   :  { %v143_v21 = vadd.f32 %v471_v18, %v142_v19 }
 0x186   :  { %v146_v22 = vmax.f32 %v143_v21, 0.0 }
 0x188   :  { %164 = vmatpush.msra.mxu2 %v146_v22 }
 0x18a   :  { %165 = vmatpush.msra.mxu2 %v145_v23 }
 0x18b   :  { %447 = vmatmul.msk.f32.vlgmr.msra.gmra.mxu2 %vm67_vm0, %v63_v24 }
 0x18c   :  { %264 = vmatpush.msrb.mxu2 %v242_v40 }
 0x18e   :  { %265 = vmatpush.msrb.mxu2 %v241_v42 }
 0x20e   :  { %v167_v27 = vpop.f32.mrf.mxu2 }
 0x20f   :  { %448 = vmatmul.msk.f32.vlgmr.msra.gmra.mxu3 %vm115_vm1, %v167_v27 }
 0x292   :  { %v198_v32 = vpop.f32.mrf.mxu3 }
 0x293   :  { %v199_v33 = vadd.f32 %v472_v31, %v198_v32 }
 0x295   :  { %223 = vrot.lane.b32.xlu0 %v199_v33, %s487_s6  ;;  %v201_v34 = vmul.f32 0.5, %v199_v33  ;;  %v214_v44 = vmul.f32 %v199_v33, %v199_v33 }
 0x297   :  { %v202_v35 = vmul.f32 1.442695, %v201_v34 }
 0x299   :  { %475 = vpow2.f32 %v202_v35 }
 0x29f   :  { %v476_v37 = vpop.eup %475 }
 0x2a0   :  { %v208_v38 = vmul.f32 %v476_v37, %v206_v36  ;;  %v215_v39 = vmul.f32 %v476_v37, %v476_v37 }
 0x2a2   :  { %217 = vrot.lane.b32.xlu2 %v215_v39, %s487_s6  ;;  %210 = vrot.lane.b32.xlu1 %v208_v38, %s487_s6  ;;  %v59_v39 = vld [vmem:[%s713_s2] sm:$0xff] }
 0x2fc   :  { %v218_v43 = vpop.permute.xlu2 %217 }
 0x2fd   :  { %v220_v45 = vadd.f32 %v218_v43, %v214_v44 }
 0x2ff   :  { %v449_v46 = vadd.f32 -1.0, %v220_v45  ;;  %v60_v45 = vld [vmem:[%s713_s2 + $0x8] sm:$0xff] }
 0x307   :  { %v224_v47 = vpop.permute.xlu0 %223 }
 0x308   :  { %v226_v48 = vsub.f32 %v449_v46, %v224_v47 }
 0x30a   :  { %v227_v49 = vmul.f32 0.5, %v226_v48 }
 0x30c   :  { %v229_v50 = vsel %vm228_vm2, %v227_v49, 0.0 }
 0x30d   :  { %230 = vadd.xlane.f32.xlu1 %v229_v50 }
 0x314   :  { %v211_v51 = vpop.permute.xlu1 %210 }
 0x315   :  { %v213_v52 = vadd.f32 %v211_v51, %v199_v33  ;;  %v61_v51 = vld [vmem:[%s714_s3] sm:$0xff] }
 0x317   :  { %450 = vmatmul.msk.f32.vlgmr.msrb.gmra.mxu2 %vm67_vm0, %v213_v52 }
 0x380   :  { %v231_v53 = vpop.xlane.xlu1 %230 }
 0x381   :  { %v232_v54 = vrot.slane %v231_v53, 4 }
 0x383   :  { %v233_v55 = vadd.f32 %v232_v54, %v231_v53  ;;  %v62_v54 = vld [vmem:[%s714_s3 + $0x8] sm:$0xff] }
 0x385   :  { %v234_v56 = vrot.slane %v233_v55, 2 }
 0x387   :  { %v235_v57 = vadd.f32 %v234_v56, %v233_v55 }
 0x389   :  { %v236_v58 = vrot.slane %v235_v57, 1 }
 0x38b   :  { %v237_v59 = vadd.f32 %v236_v58, %v235_v57 }
 0x38d   :  { %462 = vpush %v237_v59 }
 0x39a   :  { %v267_v61 = vpop.f32.mrf.mxu2 }
 0x39b   :  { %v268_v62 = vadd.f32 %v474_v60, %v267_v61 }
 0x39d   :  { %v270_v63 = vmax.f32 %v268_v62, 0.0 }
 0x39f   :  { %451 = vmatpush.msk.msrb.mxu3 %vm278_vm3, %v270_v63 }
 0x3a0   :  { %452 = vmatmul.msk.f32.vlgmr.msrb.gmra.mxu3 %vm271_vm4, %v64_v0 }
 0x3a8   :  { %453 = vmatmul.msk.f32.gmra.mxu3 %vm271_vm4, %v65_v2 }
 0x3be   :  { %s463_s2 = spop %462 }
 0x3bf   :  { %v239_v4 = vstv %s463_s2 }
 0x3c0   :  { %v240_v5 = vmul.f32 0.5, %v239_v4 }
 0x423   :  { %v299_v7 = vpop.f32.mrf.mxu3 }
 0x424   :  { %v307_v8 = vadd.f32 %v305_v6, %v299_v7 }
 0x426   :  { %v309_v9 = vmax.f32 %v307_v8, 0.0 }
 0x428   :  { %454 = vmatmul.msk.f32.vlgmr.msrb.gmra.mxu0 %vm115_vm1, %v309_v9 }
 0x42b   :  { %v302_v11 = vpop.f32.mrf.mxu3 }
 0x42c   :  { %v308_v12 = vadd.f32 %v306_v10, %v302_v11 }
 0x42e   :  { %v310_v13 = vmax.f32 %v308_v12, 0.0 }
 0x430   :  { %455 = vmatmul.msk.f32.gmra.mxu0 %vm115_vm1, %v310_v13  ;;  %456 = vmatpush.xpose.msk.msra.mxu2 %vm115_vm1, %v310_v13 }
 0x434   :  { %457 = vmatpush.xpose.msk.msra.mxu2 %vm115_vm1, %v309_v9 }
 0x4a5   :  { %v338_v14 = vpop.f32.mrf.mxu0 }
 0x4a6   :  { %458 = vmatmul.msk.f32.vlgmr.msra.gmra.mxu2 %vm115_vm1, %v338_v14 }
 0x4ad   :  { %v341_v15 = vpop.f32.mrf.mxu0 }
 0x4ae   :  { %459 = vmatmul.msk.f32.gmra.mxu2 %vm115_vm1, %v341_v15 }
 0x529   :  { %v374_v16 = vpop.f32.mrf.mxu2 }
 0x52a   :  { %v375_v17 = vadd.f32 %v374_v16, %v638_v41 }
 0x52c   :  { %v384_v18 = vand.u32 2147483647, %v375_v17  ;;  %v382_v38 = vmax.f32 %v375_v17, 0.0  ;;  %v380_v44 = vmul.f32 %v375_v17, %v59_v39 }
 0x52e   :  { %v386_v19 = vsub.f32 0.0, %v384_v18 }
 0x530   :  { %v388_v20 = vmul.f32 1.442695, %v386_v19 }
 0x531   :  { %v377_v21 = vpop.f32.mrf.mxu2 }
 0x532   :  { %477 = vpow2.f32 %v388_v20  ;;  %v378_v22 = vadd.f32 %v377_v21, %v638_v41 }
 0x534   :  { %v385_v23 = vand.u32 2147483647, %v378_v22  ;;  %v383_v48 = vmax.f32 %v378_v22, 0.0  ;;  %v381_v52 = vmul.f32 %v378_v22, %v60_v45 }
 0x536   :  { %v387_v24 = vsub.f32 0.0, %v385_v23 }
 0x538   :  { %v478_v25 = vpop.eup %477  ;;  %v390_v26 = vmul.f32 1.442695, %v387_v24 }
 0x539   :  { %v392_v27 = vadd.f32 1.0, %v478_v25  ;;  %v395_v28 = vmul.f32 -0.5, %v478_v25  ;;  %v398_v30 = vand.u32 2147483647, %v478_v25 }
 0x53a   :  { %479 = vpow2.f32 %v390_v26 }
 0x53b   :  { %481 = vlog2.f32 %v392_v27  ;;  %v396_v29 = vadd.f32 1.0, %v395_v28  ;;  %vm399_vm5 = vcmp.lt.f32.partialorder %v398_v30, 0.0004427343 }
 0x53d   :  { %v397_v35 = vmul.f32 %v478_v25, %v396_v29 }
 0x540   :  { %v480_v31 = vpop.eup %479 }
 0x541   :  { %v482_v32 = vpop.eup %481  ;;  %v401_v33 = vadd.f32 1.0, %v480_v31  ;;  %v404_v36 = vmul.f32 -0.5, %v480_v31  ;;  %v407_v42 = vand.u32 2147483647, %v480_v31 }
 0x542   :  { %v394_v34 = vmul.f32 0.6931472, %v482_v32 }
 0x543   :  { %483 = vlog2.f32 %v401_v33  ;;  %v405_v40 = vadd.f32 1.0, %v404_v36  ;;  %vm408_vm6 = vcmp.lt.f32.partialorder %v407_v42, 0.0004427343 }
 0x544   :  { %v400_v37 = vsel %vm399_vm5, %v397_v35, %v394_v34 }
 0x545   :  { %v410_v41 = vadd.f32 %v400_v37, %v382_v38  ;;  %v406_v47 = vmul.f32 %v480_v31, %v405_v40 }
 0x547   :  { %v412_v49 = vsub.f32 %v380_v44, %v410_v41 }
 0x549   :  { %v484_v43 = vpop.eup %483  ;;  %v414_v56 = vmul.f32 %v412_v49, %v61_v51 }
 0x54a   :  { %v403_v46 = vmul.f32 0.6931472, %v484_v43 }
 0x54b   :  { %v416_v58 = vsel %vm67_vm0, %v414_v56, 0.0 }
 0x54c   :  { %v409_v50 = vsel %vm408_vm6, %v406_v47, %v403_v46 }
 0x54d   :  { %v411_v53 = vadd.f32 %v409_v50, %v383_v48 }
 0x54f   :  { %v413_v55 = vsub.f32 %v381_v52, %v411_v53 }
 0x551   :  { %v415_v57 = vmul.f32 %v413_v55, %v62_v54 }
 0x553   :  { %v417_v59 = vsel %vm67_vm0, %v415_v57, 0.0 }
 0x554   :  { %v418_v60 = vadd.f32 %v417_v59, %v416_v58 }
 0x556   :  { %419 = vadd.xlane.f32.xlu2 %v418_v60 }
 0x5c9   :  { %v420_v61 = vpop.xlane.xlu2 %419 }
 0x5ca   :  { %v421_v62 = vrot.slane %v420_v61, 4 }
 0x5cc   :  { %v422_v63 = vadd.f32 %v421_v62, %v420_v61 }
 0x5ce   :  { %v423_v0 = vrot.slane %v422_v63, 2 }
 0x5d0   :  { %v424_v1 = vadd.f32 %v423_v0, %v422_v63 }
 0x5d2   :  { %v425_v2 = vrot.slane %v424_v1, 1 }
 0x5d4   :  { %v426_v3 = vadd.f32 %v425_v2, %v424_v1 }
 0x5d6   :  { %464 = vpush %v426_v3 }
 0x607   :  { %s465_s3 = spop %464 }
 0x608   :  { %v428_v6 = vstv %s465_s3 }
 0x609   :  { %v429_v7 = vsub.f32 %v428_v6, %v240_v5  ;;  %v431_v9 = vsub.f32 0.0, %v428_v6 }
 0x60b   :  { %v430_v8 = vsub.f32 0.0, %v429_v7 }
 0x60d   :  { %v433_v10 = vsel %vm432_vm7, %v430_v8, %v431_v9 }
 0x60e   :  { %v434_v11 = vsel %vm271_vm4, %v433_v10, %v240_v5 }
 0x60f   :  { %v436_v12 = vsel %vm435_vm8, %v434_v11, %v428_v6 }
 0x610   :  { %438 = vst.msk [vmem:[%s715_s16] sm:$0x1] %vm437_vm9, %v436_v12 }

</bundles_post_ra>
